<compile_context>
chip_gen: v7x
topology: tpu7x:2x2x1
jax: 0.10.0
libtpu: 0.0.40
codegen_flags: <defaults>
</compile_context>

<pallas_src>
import functools

import jax
import jax.numpy as jnp
from jax.experimental import pallas as pl
from jax.experimental.pallas import tpu as pltpu


def basic_layer_kernel(x_ref, w_ref, b_ref, gamma_ref, beta_ref, o_ref, acc_ref,
                       *, eps, negative_slope):
    k = pl.program_id(1)

    @pl.when(k == 0)
    def _init():
        acc_ref[...] = jnp.zeros_like(acc_ref)

    # MXU matmul with f32 accumulation; inputs stay in their native dtype
    # (no explicit upcast — bf16 inputs feed the MXU directly).
    acc_ref[...] += jnp.dot(x_ref[...], w_ref[...],
                            preferred_element_type=jnp.float32)

    @pl.when(k == pl.num_programs(1) - 1)
    def _finalize():
        # One-shot epilogue per N tile: bias, BatchNorm1d (training mode,
        # biased variance over the batch axis), LeakyReLU(negative_slope).
        y = acc_ref[...] + b_ref[...].astype(jnp.float32)
        mean = jnp.mean(y, axis=0, keepdims=True)
        centered = y - mean
        var = jnp.mean(centered * centered, axis=0, keepdims=True)
        y_hat = centered * jax.lax.rsqrt(var + eps)           # EUP rsqrt, no divide
        y_bn = (y_hat * gamma_ref[...].astype(jnp.float32)
                + beta_ref[...].astype(jnp.float32))
        out = jnp.maximum(y_bn, 0.0) + negative_slope * jnp.minimum(y_bn, 0.0)
        o_ref[...] = out.astype(o_ref.dtype)


def basic_layer(x, w_t, b, gamma, beta, *, eps=1e-5, negative_slope=0.2,
                tn=None, tk=None):
    """x: [B, D_in]; w_t: [D_in, D_out] (= W_pytorch.T); b, gamma, beta: [1, D_out]."""
    B, D_in = x.shape
    D_in_w, D_out = w_t.shape
    assert D_in_w == D_in

    # Lane-aligned (128-wide) tiles when the feature dims allow it; otherwise
    # fall back to the full extent so odd sizes still run correctly.
    if tn is None:
        tn = 128 if D_out % 128 == 0 else D_out
    if tk is None:
        tk = 128 if D_in % 128 == 0 else D_in
    assert D_out % tn == 0 and D_in % tk == 0

    # TODO(synk): if B is ever too large for a (B, tn) f32 accumulator in VMEM,
    # switch BN to a two-pass sum/sum-of-squares reduction instead of tiling B.
    grid = (D_out // tn, D_in // tk)   # (parallel N, reduction K) — K innermost

    kernel = functools.partial(basic_layer_kernel, eps=eps,
                               negative_slope=negative_slope)

    itemsize = jnp.dtype(x.dtype).itemsize
    cost = pl.CostEstimate(
        flops=2 * B * D_in * D_out,
        transcendentals=0,
        bytes_accessed=(B * D_in * itemsize * (D_out // tn)   # x re-read per N tile
                        + D_in * D_out * jnp.dtype(w_t.dtype).itemsize
                        + B * D_out * itemsize
                        + 3 * D_out * 4),
    )

    return pl.pallas_call(
        kernel,
        out_shape=jax.ShapeDtypeStruct((B, D_out), x.dtype),
        grid_spec=pltpu.PrefetchScalarGridSpec(
            num_scalar_prefetch=0,
            grid=grid,
            in_specs=[
                pl.BlockSpec((B, tk), lambda n, k: (0, k)),    # x  [B, tk]
                pl.BlockSpec((tk, tn), lambda n, k: (k, n)),   # W^T [tk, tn]
                pl.BlockSpec((1, tn), lambda n, k: (0, n)),    # bias
                pl.BlockSpec((1, tn), lambda n, k: (0, n)),    # gamma
                pl.BlockSpec((1, tn), lambda n, k: (0, n)),    # beta
            ],
            out_specs=pl.BlockSpec((B, tn), lambda n, k: (0, n)),
            scratch_shapes=[pltpu.VMEM((B, tn), jnp.float32)],
        ),
        compiler_params=pltpu.CompilerParams(
            dimension_semantics=("parallel", "arbitrary"),
        ),
        cost_estimate=cost,
    )(x, w_t, b, gamma, beta)


if __name__ == "__main__":
    # Small but lane-aligned shapes: batch=8, dim=256 → grid (2, 2) with 128-wide tiles.
    B, D = 8, 256

    key = jax.random.PRNGKey(0)
    kx, kw, kb = jax.random.split(key, 3)

    # Parameter init shaped like nn.Linear(D, D) + nn.BatchNorm1d(D).
    bound = 1.0 / jnp.sqrt(D)
    w_pt = jax.random.uniform(kw, (D, D), jnp.float32, -bound, bound)  # [out, in]
    b = jax.random.uniform(kb, (1, D), jnp.float32, -bound, bound)
    gamma = jnp.ones((1, D), jnp.float32)    # BN weight init
    beta = jnp.zeros((1, D), jnp.float32)    # BN bias init

    x = jax.random.normal(kx, (B, D), jnp.float32)

    out = basic_layer(x, w_pt.T, b, gamma, beta)
    out = jax.block_until_ready(out)

    # Plain-JAX reference (training-mode BatchNorm1d: biased batch variance).
    y = x @ w_pt.T + b
    mean = y.mean(axis=0, keepdims=True)
    var = ((y - mean) ** 2).mean(axis=0, keepdims=True)
    y_bn = (y - mean) / jnp.sqrt(var + 1e-5) * gamma + beta
    ref = jnp.where(y_bn >= 0, y_bn, 0.2 * y_bn)
    assert jnp.allclose(out, ref, atol=1e-4, rtol=1e-4), (
        float(jnp.max(jnp.abs(out - ref))))

    print("KERNEL_OK")
</pallas_src>

<mosaic_0001>
module attributes {stable_mosaic.version = 11 : i64} {
  func.func @basic_layer_kernel(%arg0: i32, %arg1: i32, %arg2: memref<8x128xf32, #tpu.memory_space<vmem>>, %arg3: memref<128x128xf32, #tpu.memory_space<vmem>>, %arg4: memref<1x128xf32, #tpu.memory_space<vmem>>, %arg5: memref<1x128xf32, #tpu.memory_space<vmem>>, %arg6: memref<1x128xf32, #tpu.memory_space<vmem>>, %arg7: memref<8x128xf32, #tpu.memory_space<vmem>>, %arg8: memref<8x128xf32, #tpu.memory_space<vmem>>) attributes {dimension_semantics = [#tpu.dimension_semantics<parallel>, #tpu.dimension_semantics<arbitrary>], iteration_bounds = array<i64: 2, 2>, scalar_prefetch = 0 : i64, scratch_operands = 1 : i64, tpu.core_type = #tpu.core_type<tc>, window_params = [{transform_indices = @transform_0, window_bounds = array<i64: 8, 128>}, {transform_indices = @transform_1, window_bounds = array<i64: 128, 128>}, {transform_indices = @transform_2, window_bounds = array<i64: 1, 128>}, {transform_indices = @transform_3, window_bounds = array<i64: 1, 128>}, {transform_indices = @transform_4, window_bounds = array<i64: 1, 128>}, {transform_indices = @transform_5, window_bounds = array<i64: 8, 128>}]} {
    %c0_i32 = arith.constant 0 : i32
    %0 = arith.cmpi eq, %arg1, %c0_i32 : i32
    %1 = arith.extui %0 : i1 to i32
    %c0_i32_0 = arith.constant 0 : i32
    %2 = arith.cmpi ne, %1, %c0_i32_0 : i32
    scf.if %2 {
      %cst_9 = arith.constant 0.000000e+00 : f32
      %12 = vector.broadcast %cst_9 : f32 to vector<8x128xf32>
      %c0_10 = arith.constant 0 : index
      %c0_11 = arith.constant 0 : index
      %13 = vector.load %arg8[%c0_10, %c0_11] : memref<8x128xf32, #tpu.memory_space<vmem>>, vector<8x128xf32>
      tpu.vector_store %arg8[%c0_10, %c0_11], %12 {strides = array<i32>} : memref<8x128xf32, #tpu.memory_space<vmem>>, vector<8x128xf32>,
    } else {
    }
    %c0 = arith.constant 0 : index
    %c0_1 = arith.constant 0 : index
    %3 = vector.load %arg8[%c0, %c0_1] : memref<8x128xf32, #tpu.memory_space<vmem>>, vector<8x128xf32>
    %c0_2 = arith.constant 0 : index
    %c0_3 = arith.constant 0 : index
    %4 = vector.load %arg2[%c0_2, %c0_3] : memref<8x128xf32, #tpu.memory_space<vmem>>, vector<8x128xf32>
    %c0_4 = arith.constant 0 : index
    %c0_5 = arith.constant 0 : index
    %5 = vector.load %arg3[%c0_4, %c0_5] : memref<128x128xf32, #tpu.memory_space<vmem>>, vector<128x128xf32>
    %cst = arith.constant dense<0.000000e+00> : vector<8x128xf32>
    %6 = tpu.matmul %4, %5, %cst {dimension_numbers = #tpu.dot_dimension_numbers<[1], [0], [0], [1], [0, 0, 1, 1], [], []>} : vector<8x128xf32>, vector<128x128xf32>, vector<8x128xf32> -> vector<8x128xf32>
    %7 = arith.addf %3, %6 : vector<8x128xf32>
    %c0_6 = arith.constant 0 : index
    %c0_7 = arith.constant 0 : index
    %8 = vector.load %arg8[%c0_6, %c0_7] : memref<8x128xf32, #tpu.memory_space<vmem>>, vector<8x128xf32>
    tpu.vector_store %arg8[%c0_6, %c0_7], %7 {strides = array<i32>} : memref<8x128xf32, #tpu.memory_space<vmem>>, vector<8x128xf32>,
    %c1_i32 = arith.constant 1 : i32
    %9 = arith.cmpi eq, %arg1, %c1_i32 : i32
    %10 = arith.extui %9 : i1 to i32
    %c0_i32_8 = arith.constant 0 : i32
    %11 = arith.cmpi ne, %10, %c0_i32_8 : i32
    scf.if %11 {
      %c0_9 = arith.constant 0 : index
      %c0_10 = arith.constant 0 : index
      %12 = vector.load %arg8[%c0_9, %c0_10] : memref<8x128xf32, #tpu.memory_space<vmem>>, vector<8x128xf32>
      %c0_11 = arith.constant 0 : index
      %c0_12 = arith.constant 0 : index
      %13 = vector.load %arg4[%c0_11, %c0_12] : memref<1x128xf32, #tpu.memory_space<vmem>>, vector<1x128xf32>
      %14 = vector.broadcast %13 : vector<1x128xf32> to vector<8x128xf32>
      %15 = arith.addf %12, %14 : vector<8x128xf32>
      %cst_13 = arith.constant dense<0.000000e+00> : vector<128xf32>
      %16 = vector.multi_reduction <add>, %15, %cst_13 [0] : vector<8x128xf32> to vector<128xf32>
      %17 = vector.shape_cast %16 : vector<128xf32> to vector<1x128xf32>
      %cst_14 = arith.constant 8.000000e+00 : f32
      %18 = vector.broadcast %cst_14 : f32 to vector<1x128xf32>
      %19 = arith.divf %17, %18 : vector<1x128xf32>
      %20 = vector.broadcast %19 : vector<1x128xf32> to vector<8x128xf32>
      %21 = arith.subf %15, %20 : vector<8x128xf32>
      %22 = arith.mulf %21, %21 : vector<8x128xf32>
      %cst_15 = arith.constant dense<0.000000e+00> : vector<128xf32>
      %23 = vector.multi_reduction <add>, %22, %cst_15 [0] : vector<8x128xf32> to vector<128xf32>
      %24 = vector.shape_cast %23 : vector<128xf32> to vector<1x128xf32>
      %cst_16 = arith.constant 8.000000e+00 : f32
      %25 = vector.broadcast %cst_16 : f32 to vector<1x128xf32>
      %26 = arith.divf %24, %25 : vector<1x128xf32>
      %cst_17 = arith.constant 9.99999974E-6 : f32
      %27 = vector.broadcast %cst_17 : f32 to vector<1x128xf32>
      %28 = arith.addf %26, %27 : vector<1x128xf32>
      %29 = math.rsqrt %28 : vector<1x128xf32>
      %30 = vector.broadcast %29 : vector<1x128xf32> to vector<8x128xf32>
      %31 = arith.mulf %21, %30 : vector<8x128xf32>
      %c0_18 = arith.constant 0 : index
      %c0_19 = arith.constant 0 : index
      %32 = vector.load %arg5[%c0_18, %c0_19] : memref<1x128xf32, #tpu.memory_space<vmem>>, vector<1x128xf32>
      %33 = vector.broadcast %32 : vector<1x128xf32> to vector<8x128xf32>
      %34 = arith.mulf %31, %33 : vector<8x128xf32>
      %c0_20 = arith.constant 0 : index
      %c0_21 = arith.constant 0 : index
      %35 = vector.load %arg6[%c0_20, %c0_21] : memref<1x128xf32, #tpu.memory_space<vmem>>, vector<1x128xf32>
      %36 = vector.broadcast %35 : vector<1x128xf32> to vector<8x128xf32>
      %37 = arith.addf %34, %36 : vector<8x128xf32>
      %cst_22 = arith.constant 0.000000e+00 : f32
      %38 = vector.broadcast %cst_22 : f32 to vector<8x128xf32>
      %39 = arith.maximumf %37, %38 : vector<8x128xf32>
      %cst_23 = arith.constant 0.000000e+00 : f32
      %40 = vector.broadcast %cst_23 : f32 to vector<8x128xf32>
      %41 = arith.minimumf %37, %40 : vector<8x128xf32>
      %cst_24 = arith.constant 2.000000e-01 : f32
      %42 = vector.broadcast %cst_24 : f32 to vector<8x128xf32>
      %43 = arith.mulf %42, %41 : vector<8x128xf32>
      %44 = arith.addf %39, %43 : vector<8x128xf32>
      %c0_25 = arith.constant 0 : index
      %c0_26 = arith.constant 0 : index
      %45 = vector.load %arg7[%c0_25, %c0_26] : memref<8x128xf32, #tpu.memory_space<vmem>>, vector<8x128xf32>
      tpu.vector_store %arg7[%c0_25, %c0_26], %44 {strides = array<i32>} : memref<8x128xf32, #tpu.memory_space<vmem>>, vector<8x128xf32>,
    } else {
    }
    return
  }
  func.func @transform_0(%arg0: i32, %arg1: i32) -> (i32, i32) {
    %c0_i32 = arith.constant 0 : i32
    %c0_i32_0 = arith.constant 0 : i32
    return %c0_i32, %arg1 : i32, i32
  }
  func.func @transform_1(%arg0: i32, %arg1: i32) -> (i32, i32) {
    %c0_i32 = arith.constant 0 : i32
    return %arg1, %arg0 : i32, i32
  }
  func.func @transform_2(%arg0: i32, %arg1: i32) -> (i32, i32) {
    %c0_i32 = arith.constant 0 : i32
    %c0_i32_0 = arith.constant 0 : i32
    return %c0_i32, %arg0 : i32, i32
  }
  func.func @transform_3(%arg0: i32, %arg1: i32) -> (i32, i32) {
    %c0_i32 = arith.constant 0 : i32
    %c0_i32_0 = arith.constant 0 : i32
    return %c0_i32, %arg0 : i32, i32
  }
  func.func @transform_4(%arg0: i32, %arg1: i32) -> (i32, i32) {
    %c0_i32 = arith.constant 0 : i32
    %c0_i32_0 = arith.constant 0 : i32
    return %c0_i32, %arg0 : i32, i32
  }
  func.func @transform_5(%arg0: i32, %arg1: i32) -> (i32, i32) {
    %c0_i32 = arith.constant 0 : i32
    %c0_i32_0 = arith.constant 0 : i32
    return %c0_i32, %arg0 : i32, i32
  }
}

</mosaic_0001>

<bundles_post_ra>
// kernel: tpu_custom_call.1
= control target key start
LH: loop header
LB: loop body
LE: loop exit
PB: predicated region body
PF: predicated region fallthrough
CT: control target
= control target key end

     0   :  { %s1524_s0 = inlined_call_operand.hbm [shape: f32[8,256], index: 0, kind: input, shape index: {}]   ;;  %s1525_s1 = inlined_call_operand.hbm [shape: f32[256,256], index: 1, kind: input, shape index: {}]   ;;  %s1526_s2 = inlined_call_operand.vmem [shape: f32[1,256], index: 2, kind: input, shape index: {}]   ;;  %s1527_s3 = inlined_call_operand.vmem [shape: f32[1,256], index: 3, kind: input, shape index: {}]   ;;  %s1528_s4 = inlined_call_operand.vmem [shape: f32[1,256], index: 4, kind: input, shape index: {}]   ;;  %s1529_s5 = inlined_call_operand.hbm [shape: f32[8,256], index: 5, kind: output, shape index: {}]  }
   0x1   :  { %1540 = sst [smem:[#allocation21_spill]] %s1524_s0 }
   0x2   :  { %10 = vsyncpa [#allocation4], 0 }
   0x3   :  { %12 = vsyncpa [#allocation4 + $0x1], 0 }
   0x4   :  { %13 = vsyncpa [#allocation7], 0 }
   0x5   :  { %15 = vsyncpa [#allocation7 + $0x1], 0 }
   0x6   :  { %16 = vsyncpa [#allocation5], 0 }
   0x7   :  { %18 = vsyncpa [#allocation5 + $0x1], 0  ;;  %s1127_s18 = smov 0   ;;  %s1129_s19 = smov 0  }
   0x8   :  { %s1131_s20 = smov 0   ;;  %s1133_s21 = smov 0  }
   0x9   :  { %s1135_s22 = smov 0   ;;  %s1137_s23 = smov 0  }
   0xa   :  { %s1139_s24 = smov 0   ;;  %s1141_s25 = smov 0  }
   0xb   :  { %s1143_s26 = smov 0   ;;  %s1145_s27 = smov 0  }
   0xc   :  { %s1147_s28 = smov 0   ;;  %s1149_s29 = smov 0  }
   0xd   :  { %s1151_s30 = smov 0   ;;  %s1153_s6 = smov 0  }
   0xe LB: > { %1541 = sst [smem:[#allocation12_spill]] %s1033_s18  ;;  %s1530_s7 = sadd.s32 4294967295, %s1085_s6   ;;  %s1085_s6 = sphi %s1153_s6, %s24_s6   ;;  %s1081_s30 = sphi %s1151_s30, %s1578_s30   ;;  %s1077_s29 = sphi %s1149_s29, %s1587_s29   ;;  %s1073_s28 = sphi %s1147_s28, %s1576_s28   ;;  %s1069_s27 = sphi %s1145_s27, %s1586_s27   ;;  %s1065_s26 = sphi %s1143_s26, %s1575_s26   ;;  %s1061_s25 = sphi %s1141_s25, %s1585_s25   ;;  %s1057_s24 = sphi %s1139_s24, %s1584_s24   ;;  %s1053_s23 = sphi %s1137_s23, %s1583_s23   ;;  %s1049_s22 = sphi %s1135_s22, %s1582_s22   ;;  %s1045_s21 = sphi %s1133_s21, %s1581_s21   ;;  %s1041_s20 = sphi %s1131_s20, %s1572_s20   ;;  %s1037_s19 = sphi %s1129_s19, %s1580_s19   ;;  %s1033_s18 = sphi %s1127_s18, %s1579_s18  }
   0xf   : > { %1542 = sst [smem:[#allocation13_spill]] %s1041_s20  ;;  %s33_s9 = sadd.s32 1, %s1077_s29 }
  0x10   : > { %1543 = sst [smem:[#allocation14_spill]] %s1065_s26  ;;  %s36_s10 = sadd.s32 1, %s1081_s30 }
  0x11   : > { %1544 = sst [smem:[#allocation15_spill]] %s1081_s30  ;;  %p34_p0 = scmp.ge.s32.totalorder %s33_s9, 2 }
  0x12   : > { %s43_s11 = sadd.s32 1, %s1065_s26  ;;  %p50_p1 = scmp.ne.s32.totalorder %s1065_s26, %s1061_s25 }
  0x13   : > { %p51_p2 = scmp.eq.s32.totalorder %s1085_s6, 0  ;;  %s1589_s9 = smov (%p34_p0, %s33_s9), 0 }
  0x14   : > { %1545 = sst [smem:[#allocation16_spill]] %s1589_s9  ;;  %s1591_s10 = smov (!%p34_p0, %s36_s10), %s1081_s30 }
  0x15   : > { %s40_s12 = ssub.s32 %s1077_s29, %s1589_s9  ;;  %p1210_p3 = por %p51_p2, %p50_p1 }
  0x16   : > { %p38_p4 = scmp.ge.s32.totalorder %s1591_s10, 2  ;;  %p41_p5 = scmp.eq.s32.totalorder %s40_s12, 0 }
  0x17   : > { %p56_p6 = scmp.ne.s32.totalorder %s1061_s25, %s1057_s24  ;;  %p1217_p7 = scmp.eq.s32.totalorder %s1530_s7, 0 }
  0x18   : > { %s1593_s10 = smov (%p38_p4, %s1591_s10), 0  ;;  %s71_s8 = sadd.s32 1, %s1053_s23 }
  0x19   : > { %1548 = sst [smem:[#allocation17_spill]] %s1593_s10  ;;  %p1228_p8 = por %p1217_p7, %p56_p6 }
  0x1a   : > { %s1224_s15 = scalar_select %p41_p5, %s1065_s26, %s43_s11  }
  0x1b   : > { %s1550_s16 = scalar_select %p1228_p8, 1, 0 }
  0x1c   : > { %1549 = sst [smem:[#allocation18_spill]] %s1224_s15  ;;  %s67_s17 = ssub.s32 %s1081_s30, %s1593_s10 }
  0x1d   : > { %s68_s24 = sor.u32 %s67_s17, %s40_s12  ;;  %p78_p10 = scmp.ne.s32.totalorder %s1053_s23, %s1049_s22 }
  0x1e   : > { %p69_p9 = scmp.eq.s32.totalorder %s68_s24, 0  ;;  %p84_p11 = scmp.ne.s32.totalorder %s1049_s22, %s1045_s21 }
  0x1f   : > { %p173_p12 = scmp.eq.s32.totalorder %s67_s17, 0  ;;  %p1244_p13 = por %p78_p10, %p51_p2 }
  0x20   : > { %s1240_s11 = scalar_select %p69_p9, %s1053_s23, %s71_s8  }
  0x21   : > { %p1250_p0 = por %p84_p11, %p1217_p7  ;;  %s175_s12 = sadd.s32 1, %s1041_s20 }
  0x22   : > { %1551 = sst [smem:[#allocation19_spill]] %s1240_s11  ;;  %p185_p1 = scmp.ne.s32.totalorder %s1041_s20, %s1037_s19 }
  0x23   : > { %s1553_s9 = scalar_select %p1250_p0, 1, 0 }
  0x24   : > { %s1258_s24 = scalar_select %p173_p12, %s1041_s20, %s175_s12  }
  0x25   : > { %s1555_s21 = sadd.s32 4294967295, %s1085_s6   ;;  %p191_p5 = scmp.ne.s32.totalorder %s1037_s19, %s1033_s18 }
  0x26   : > { %1554 = sst [smem:[#allocation20_spill]] %s1258_s24  ;;  %p186_p4 = scmp.eq.s32.totalorder %s1555_s21, 3 }
  0x27   : > { %s1556_s8 = sadd.s32 4294967294, %s1085_s6   ;;  %p752_p7 = scmp.lt.s32.totalorder %s1085_s6, 4 }
  0x28   : > { %p192_p2 = scmp.eq.s32.totalorder %s1556_s8, 3  ;;  %p1266_p6 = por %p186_p4, %p185_p1 }
  0x29   : > { %s212_s10 = sand.u32 1, %s1065_s26   ;;  %s640_s12 = sshll.u32 %s1077_s29, 7 }
  0x2a   : > { %s1557_s17 = scalar_select %p1266_p6, 1, 0 }
  0x2b   : > { %p1271_p9 = por %p192_p2, %p191_p5  ;;  %s639_s15 = sshll.u32 %s212_s10, 3 }
  0x2c   : > { %s1559_s0 = sld [smem:[#allocation21_spill]]  ;;  %s216_s8 = scalar_lea.vmem [#allocation3], %s639_s15 }
  0x2d   : > { %s1558_s14 = scalar_select %p1271_p9, 1, 0 }
  0x2e   : > { %s223_s20 = sshll.u32 %s216_s8, 4  ;;  %p1286_p10 = pnand %p752_p7, %p1210_p3  ;;  %s1282_s20 = int_to_ptr.vmem [resolvable:$true] %s223_s20 }
  0x2f   : > { %p1293_p11 = pnand %p752_p7, %p1244_p13  ;;  %s213_s24 = scalar_lea.sflag [#allocation4], %s212_s10 }
  0x30   : > { %p877_p4 = pneg %p1286_p10 }
  0x32   : > { %s1280_s21 = scalar_lea.hbm %s1559_s0, %s640_s12  ;;  %s880_s8 = scalar_lea.hbm %s1559_s0, 256 }
  0x33   : > { %s875_s15 = scalar_lea.hbm %s1280_s21, 128  ;;  %p881_p13 = scmp.lt.u32.totalorder %s1280_s21, %s1559_s0 }
  0x34   : > { %p876_p1 = scmp.ne.s32.totalorder %s1280_s21, %s875_s15  ;;  %p882_p2 = scmp.lt.u32.totalorder %s880_s8, %s875_s15 }
  0x35   : > { %p884_p12 = scmp.lt.u32.totalorder %s875_s15, %s1280_s21 }
  0x36   : > { %p878_p3 = pnand %p877_p4, %p876_p1  ;;  %p883_p7 = por %p882_p2, %p881_p13 }
  0x38   : > { %p879_p5 = pneg %p878_p3  ;;  %p885_p9 = por %p884_p12, %p883_p7 }
  0x3a   : > { %p886_p6 = pnand %p885_p9, %p879_p5 }
  0x3c   : > { %889 = shalt.err (!%p886_p6)
}
  0x3d   : > { %s890_s10 = scalar_lea.vmem %s1282_s20, 128  ;;  %s1087_s13 = smov [#allocation3]  }
  0x3e   : > { %p891_p1 = scmp.ne.s32.totalorder %s1282_s20, %s890_s10  ;;  %s895_s12 = sshll.u32 %s1087_s13, 4  ;;  %s896_s12 = int_to_ptr.vmem [resolvable:$false] %s895_s12 }
  0x3f   : > { %s897_s26 = scalar_lea.vmem %s896_s12, 256  ;;  %p898_p8 = scmp.lt.s32.totalorder %s1282_s20, %s896_s12 }
  0x40   : > { %p893_p3 = pnand %p891_p1, %p877_p4  ;;  %p899_p13 = scmp.lt.s32.totalorder %s897_s26, %s890_s10 }
  0x42   : > { %p894_p0 = pneg %p893_p3  ;;  %p900_p2 = por %p899_p13, %p898_p8 }
  0x44   : > { %p901_p12 = pnand %p900_p2, %p894_p0 }
  0x46   : > { %904 = shalt.err (!%p901_p12)
}
  0x47   : > { %744 = dma.hbm_to_vmem [thread:$0]  (!%p1286_p10), %s1280_s21, 128, %s1282_s20, %s213_s24  }
  0x48   : > { %p269_p6 = scmp.lt.s32.totalorder %s1085_s6, 5  ;;  %s230_s15 = sand.u32 1, %s1053_s23  }
  0x49   : > { %s1562_s8 = sshll.u32 %s1077_s29, 5  ;;  %p1563_p9 = scmp.ge.s32.totalorder %s1085_s6, 1 }
  0x4a   : > { %s240_s7 = sadd.s32 %s1081_s30, %s1562_s8  ;;  %s641_s18 = sshll.u32 %s230_s15, 7 }
  0x4b   : > { %p1330_p8 = pnand %p1563_p9, %p269_p6  ;;  %s644_s13 = sshll.u32 %s240_s7, 7 }
  0x4c   : > { %s1337_s0 = scalar_lea.hbm %s1525_s1, %s644_s13  ;;  %s234_s20 = scalar_lea.vmem [#allocation6], %s641_s18 }
  0x4d   : > { %s243_s21 = sshll.u32 %s234_s20, 4  ;;  %s1341_s24 = scalar_lea.sflag [#allocation7], %s230_s15  ;;  %s1339_s21 = int_to_ptr.vmem [resolvable:$true] %s243_s21 }
  0x4e   : > { %s905_s8 = scalar_lea.hbm %s1337_s0, 2048  ;;  %p907_p10 = pneg %p1293_p11 }
  0x4f   : > { %p906_p0 = scmp.ne.s32.totalorder %s1337_s0, %s905_s8  ;;  %s910_s12 = scalar_lea.hbm %s1525_s1, 8192 }
  0x50   : > { %p911_p7 = scmp.lt.u32.totalorder %s1337_s0, %s1525_s1  ;;  %p912_p1 = scmp.lt.u32.totalorder %s910_s12, %s905_s8 }
  0x51   : > { %p908_p4 = pnand %p907_p10, %p906_p0  ;;  %p914_p13 = scmp.lt.u32.totalorder %s905_s8, %s1337_s0 }
  0x52   : > { %p913_p3 = por %p912_p1, %p911_p7 }
  0x53   : > { %p909_p5 = pneg %p908_p4 }
  0x54   : > { %p915_p2 = por %p914_p13, %p913_p3 }
  0x56   : > { %p916_p12 = pnand %p915_p2, %p909_p5 }
  0x58   : > { %919 = shalt.err (!%p916_p12)
}
  0x59   : > { %s920_s15 = scalar_lea.vmem %s1339_s21, 2048  ;;  %s1088_s18 = smov [#allocation6]  }
  0x5a   : > { %p921_p6 = scmp.ne.s32.totalorder %s1339_s21, %s920_s15  ;;  %s925_s20 = sshll.u32 %s1088_s18, 4  ;;  %s926_s20 = int_to_ptr.vmem [resolvable:$false] %s925_s20 }
  0x5b   : > { %s927_s30 = scalar_lea.vmem %s926_s20, 4096  ;;  %p928_p4 = scmp.lt.s32.totalorder %s1339_s21, %s926_s20 }
  0x5c   : > { %p923_p9 = pnand %p921_p6, %p907_p10  ;;  %p929_p7 = scmp.lt.s32.totalorder %s927_s30, %s920_s15 }
  0x5e   : > { %p924_p0 = pneg %p923_p9  ;;  %p930_p1 = por %p929_p7, %p928_p4 }
  0x60   : > { %p931_p3 = pnand %p930_p1, %p924_p0 }
  0x62   : > { %934 = shalt.err (!%p931_p3)
}
  0x63   : > { %s1089_s8 = smov 256   ;;  %s1090_s7 = smov 128  }
  0x64   : > { %s1091_s13 = smov 8   ;;  %273 = sbr.rel (%p1330_p8) target bundleno = 463 (0x1cf), region = 40 }
  0x65   : > { %747 = dma.hbm_to_vmem [thread:$0]  (!%p1293_p11), %s1337_s0, 2048, %s1339_s21, %s1341_s24, %s1089_s8, %s1090_s7, %s1091_s13  }
  0x66   : > { %s275_s12 = sand.u32 (!%p1330_p8), 1, %s1061_s25   ;;  %p1565_p10 = scmp.ne.s32.totalorder (!%p1330_p8), %s1550_s16, 0 }
  0x67   : > { %s1372_s26 = sshll.u32 (!%p1330_p8), %s275_s12, 3  ;;  %s276_s15 = scalar_lea.sflag (!%p1330_p8), [#allocation4], %s275_s12 }
  0x68   : > { %s279_s18 = scalar_lea.vmem (!%p1330_p8), [#allocation3], %s1372_s26 }
  0x6b   : > { %1020 = dma.done.wait (%p1565_p10), %s276_s15, 128  }
  0x6c   : > { %1022 = vsyncadd (%p1565_p10), %s276_s15, 4294967168  ;;  %s284_s11 = sand.u32 1, %s1049_s22   ;;  %p1566_p11 = scmp.ne.s32.totalorder %s1553_s9, 0 }
  0x6d   : > { %s647_s0 = sshll.u32 %s284_s11, 7  ;;  %s285_s21 = scalar_lea.sflag [#allocation7], %s284_s11 }
  0x6e   : > { %s1380_s10 = scalar_lea.vmem [#allocation6], %s647_s0 }
  0x6f   : > { %1024 = dma.done.wait (%p1566_p11), %s285_s21, 2048  }
  0x70   : > { %1026 = vsyncadd (%p1566_p11), %s285_s21, 4294965248  ;;  %s326_s24 = sand.u32 1, %s1037_s19   ;;  %p330_p8 = scmp.lt.s32.totalorder %s1073_s28, 1 }
  0x71   : > { %s1390_s16 = sshll.u32 %s326_s24, 3  ;;  %p649_p5 = scmp.ne.s32.totalorder %s1069_s27, 0 }
  0x72   : > { %s1393_s20 = scalar_select %p330_p8, %s1073_s28, 1 }
  0x73   : > { %s328_s21 = scalar_lea.vmem [#allocation8], %s1390_s16  ;;  %342 = sbr.rel (%p649_p5) target bundleno = 122 (0x7a), region = 52  ;;  %v1092_v0 = vmov (!%p649_p5), 0.0  }
  0x74   : > { %s332_s9 = scalar_lea.vmem %s1526_s2, %s1393_s20  ;;  %s335_s12 = scalar_lea.vmem %s1527_s3, %s1393_s20  ;;  %343 = vst [vmem:[#allocation2] sm:$0xff] (!%p649_p5), %v1092_v0 }
  0x75   : > { %s338_s0 = scalar_lea.vmem %s1528_s4, %s1393_s20 }
  0x7a PF: > { %v346_v1 = vld [vmem:[%s1380_s10] sm:$0xff]  ;;  %v347_v2 = vld [vmem:[%s1380_s10 + $0x8] sm:$0xff]  ;;  %v348_v3 = vld [vmem:[%s1380_s10 + $0x10] sm:$0xff]  ;;  %v1093_v4 = vmov 0.0|0.0   ;;  %vm1094_vm0 = vmmov 0   ;;  %v1095_v7 = vmov 0.0  }
  0x7b   : > { %711 = vmatprep.subr.bf16.mxu0 %v1093_v4  ;;  %v712_v5 = vpack.c.bf16 %v347_v2, %v346_v1  ;;  %v349_v6 = vld [vmem:[%s1380_s10 + $0x18] sm:$0xff]  ;;  %708 = vmatprep.mubr.msk.f32.mxu0 %vm1094_vm0, %v1095_v7  ;;  %v350_v9 = vld [vmem:[%s1380_s10 + $0x20] sm:$0xff]  ;;  %v351_v10 = vld [vmem:[%s1380_s10 + $0x28] sm:$0xff]  ;;  %p650_p13 = scmp.ne.s32.totalorder %s1069_s27, 1 }
  0x7c   : > { %v715_v8 = vpack.c.bf16 %v349_v6, %v348_v3  ;;  %v718_v11 = vpack.c.bf16 %v351_v10, %v350_v9  ;;  %v352_v12 = vld [vmem:[%s1380_s10 + $0x30] sm:$0xff]  ;;  %v353_v13 = vld [vmem:[%s1380_s10 + $0x38] sm:$0xff]  ;;  %v354_v15 = vld [vmem:[%s1380_s10 + $0x40] sm:$0xff] }
  0x7d   : > { %713 = vmatpush3.bf16.msra.mxu0 %v712_v5  ;;  %v721_v14 = vpack.c.bf16 %v353_v13, %v352_v12  ;;  %v355_v16 = vld [vmem:[%s1380_s10 + $0x48] sm:$0xff]  ;;  %v356_v18 = vld [vmem:[%s1380_s10 + $0x50] sm:$0xff]  ;;  %v357_v19 = vld [vmem:[%s1380_s10 + $0x58] sm:$0xff] }
  0x7e   : > { %714 = vmatprep.subr.bf16.mxu0 %v1093_v4  ;;  %v724_v17 = vpack.c.bf16 %v355_v16, %v354_v15  ;;  %v727_v20 = vpack.c.bf16 %v357_v19, %v356_v18  ;;  %v358_v21 = vld [vmem:[%s1380_s10 + $0x60] sm:$0xff]  ;;  %v359_v22 = vld [vmem:[%s1380_s10 + $0x68] sm:$0xff]  ;;  %v360_v24 = vld [vmem:[%s1380_s10 + $0x70] sm:$0xff] }
  0x7f   : > { %v730_v23 = vpack.c.bf16 %v359_v22, %v358_v21  ;;  %v361_v25 = vld [vmem:[%s1380_s10 + $0x78] sm:$0xff]  ;;  %v344_v28 = vld [vmem:[#allocation2] sm:$0xff] }
  0x80   : > { %v733_v26 = vpack.c.bf16 %v361_v25, %v360_v24  ;;  %v345_v27 = vld [vmem:[%s279_s18] sm:$0xff]  ;;  %v651_v33 = vld [vmem:[%s332_s9] ss:$0 sm:$0xff] (!%p650_p13) }
  0x81   : > { %716 = vmatpush3.bf16.msra.mxu0 %v715_v8  ;;  %v652_v53 = vld [vmem:[%s335_s12] ss:$0 sm:$0xff] (!%p650_p13) }
  0x82   : > { %717 = vmatprep.subr.bf16.mxu0 %v1093_v4  ;;  %v653_v55 = vld [vmem:[%s338_s0] ss:$0 sm:$0xff] (!%p650_p13) }
  0x85   : > { %719 = vmatpush3.bf16.msra.mxu0 %v718_v11 }
  0x86   : > { %720 = vmatprep.subr.bf16.mxu0 %v1093_v4 }
  0x89   : > { %722 = vmatpush3.bf16.msra.mxu0 %v721_v14 }
  0x8a   : > { %723 = vmatprep.subr.bf16.mxu0 %v1093_v4 }
  0x8d   : > { %725 = vmatpush3.bf16.msra.mxu0 %v724_v17 }
  0x8e   : > { %726 = vmatprep.subr.bf16.mxu0 %v1093_v4 }
  0x91   : > { %728 = vmatpush3.bf16.msra.mxu0 %v727_v20 }
  0x92   : > { %729 = vmatprep.subr.bf16.mxu0 %v1093_v4 }
  0x95   : > { %731 = vmatpush3.bf16.msra.mxu0 %v730_v23 }
  0x96   : > { %732 = vmatprep.subr.bf16.mxu0 %v1093_v4 }
  0x99   : > { %734 = vmatpush3.bf16.msra.mxu0 %v733_v26 }
  0x9c   : > { %709 = vmatmul.mubr.f32.vlgmr.msra.gmra.mrb[0].mxu0 %v345_v27 }
 0x16c   : > { %437 = sbr.rel (%p650_p13) target bundleno = 438 (0x1b6), region = 56 }
 0x16f   : > { %v428_v29 = vpop.f32.mrb[0].mxu0 }
 0x170   : > { %v432_v30 = vadd.f32 %v428_v29, %v344_v28  ;;  %v710_v31 = vpop.f32.mrb[1].mxu0 }
 0x172   : > { %433 = vst [vmem:[#allocation2] sm:$0xff] %v432_v30 }
 0x179   : > { %v438_v32 = vld [vmem:[#allocation2] sm:$0xff] }
 0x17a   : > { %v446_v34 = vadd.f32 %v651_v33, %v438_v32 }
 0x17c   : > { %v447_v35 = vrot.slane %v446_v34, 4 }
 0x17e   : > { %v448_v36 = vadd.f32 %v447_v35, %v446_v34 }
 0x180   : > { %v449_v37 = vrot.slane %v448_v36, 2 }
 0x182   : > { %v450_v38 = vadd.f32 %v449_v37, %v448_v36 }
 0x184   : > { %v451_v39 = vrot.slane %v450_v38, 1 }
 0x186   : > { %v452_v40 = vadd.f32 %v451_v39, %v450_v38 }
 0x188   : > { %v454_v41 = vmul.f32 0.125, %v452_v40 }
 0x18a   : > { %v455_v42 = vsub.f32 %v446_v34, %v454_v41 }
 0x18c   : > { %v456_v43 = vmul.f32 %v455_v42, %v455_v42 }
 0x18e   : > { %v457_v44 = vrot.slane %v456_v43, 4 }
 0x190   : > { %v458_v45 = vadd.f32 %v457_v44, %v456_v43 }
 0x192   : > { %v459_v46 = vrot.slane %v458_v45, 2 }
 0x194   : > { %v460_v47 = vadd.f32 %v459_v46, %v458_v45 }
 0x196   : > { %v461_v48 = vrot.slane %v460_v47, 1 }
 0x198   : > { %v462_v49 = vadd.f32 %v461_v48, %v460_v47 }
 0x19a   : > { %v463_v50 = vmul.f32 0.125, %v462_v49 }
 0x19c   : > { %v464_v51 = vadd.f32 1e-05, %v463_v50 }
 0x19e   : > { %873 = vrsqrt.f32 %v464_v51 }
 0x1a8   : > { %v874_v52 = vpop.eup %873 }
 0x1a9   : > { %v466_v54 = vmul.f32 %v874_v52, %v455_v42 }
 0x1ab   : > { %v474_v56 = vmul.f32 %v652_v53, %v466_v54 }
 0x1ad   : > { %v482_v57 = vadd.f32 %v653_v55, %v474_v56 }
 0x1af   : > { %v483_v58 = vmax.f32 %v482_v57, 0.0  ;;  %v484_v59 = vmin.f32 %v482_v57, 0.0 }
 0x1b1   : > { %v485_v60 = vmul.f32 0.2, %v484_v59 }
 0x1b3   : > { %v486_v61 = vadd.f32 %v485_v60, %v483_v58 }
 0x1b5   : > { %487 = vst [vmem:[%s328_s21] sm:$0xff] %v486_v61 }
 0x1b6 PF: > { %s655_s9 = sshll.u32 %s1073_s28, 7  ;;  %s502_s20 = sshll.u32 %s328_s21, 4  ;;  %s503_s20 = int_to_ptr.vmem [resolvable:$true] %s502_s20 }
 0x1b7   : > { %s1449_s12 = scalar_lea.hbm %s1529_s5, %s655_s9  ;;  %s489_s15 = scalar_lea.sflag [#allocation5], %s326_s24 }
 0x1b8   : > { %s935_s11 = scalar_lea.vmem %s503_s20, 128  ;;  %p1567_p12 = scmp.ne.s32.totalorder %s1557_s17, 0 }
 0x1b9   : > { %p936_p2 = scmp.ne.s32.totalorder %s503_s20, %s935_s11  ;;  %s1096_s0 = smov [#allocation8]  }
 0x1ba   : > { %s939_s30 = sshll.u32 %s1096_s0, 4  ;;  %s940_s30 = int_to_ptr.vmem [resolvable:$false] %s939_s30 }
 0x1bb   : > { %p937_p6 = pnand %p936_p2, %p1567_p12  ;;  %s941_s8 = scalar_lea.vmem %s940_s30, 256 }
 0x1bc   : > { %p942_p0 = scmp.lt.s32.totalorder %s503_s20, %s940_s30  ;;  %p943_p4 = scmp.lt.s32.totalorder %s941_s8, %s935_s11 }
 0x1bd   : > { %p938_p9 = pneg %p937_p6 }
 0x1be   : > { %p944_p7 = por %p943_p4, %p942_p0 }
 0x1c0   : > { %p945_p1 = pnand %p944_p7, %p938_p9 }
 0x1c2   : > { %948 = shalt.err (!%p945_p1)
}
 0x1c3   : > { %s949_s28 = scalar_lea.hbm %s1449_s12, 128  ;;  %s953_s21 = scalar_lea.hbm %s1529_s5, 256 }
 0x1c4   : > { %p950_p3 = scmp.ne.s32.totalorder %s1449_s12, %s949_s28  ;;  %p954_p8 = scmp.lt.u32.totalorder %s1449_s12, %s1529_s5 }
 0x1c5   : > { %p955_p5 = scmp.lt.u32.totalorder %s953_s21, %s949_s28  ;;  %p957_p2 = scmp.lt.u32.totalorder %s949_s28, %s1449_s12 }
 0x1c6   : > { %p951_p10 = pnand %p950_p3, %p1567_p12 }
 0x1c7   : > { %p956_p13 = por %p955_p5, %p954_p8 }
 0x1c8   : > { %p952_p11 = pneg %p951_p10 }
 0x1c9   : > { %p958_p6 = por %p957_p2, %p956_p13 }
 0x1cb   : > { %p959_p9 = pnand %p958_p6, %p952_p11 }
 0x1cd   : > { %962 = shalt.err (!%p959_p9)
}
 0x1ce   : > { %739 = dma.vmem_to_hbm [thread:$0]  (%p1567_p12), %s503_s20, 128, %s1449_s12, %s489_s15  }
 0x1cf PF: > { %s1568_s18 = sld [smem:[#allocation12_spill]]  ;;  %p753_p0 = scmp.ge.s32.totalorder %s1085_s6, 2 }
 0x1d0   : > { %p1569_p4 = scmp.ne.s32.totalorder %s1558_s14, 0 }
 0x1d2   : > { %p749_p7 = pnand %p753_p0, %p1569_p4 }
 0x1d5   : > { %s514_s10 = sand.u32 1, %s1568_s18  }
 0x1d6   : > { %s515_s9 = scalar_lea.sflag [#allocation5], %s514_s10 }
 0x1d7   : > { %1028 = dma.done.wait (!%p749_p7), %s515_s9, 128  }
 0x1d8   : > { %1030 = vsyncadd (!%p749_p7), %s515_s9, 4294967168  ;;  %s24_s6 = sadd.s32 1, %s1085_s6   ;;  %s1571_s17 = sld [smem:[#allocation13_spill]] }
 0x1d9   : > { %p1477_p1 = scmp.ge.s32.totalorder %s24_s6, 6   ;;  %s1572_s20 = sld [smem:[#allocation20_spill]] }
 0x1da   : > { %s1573_s13 = sld [smem:[#allocation19_spill]]  ;;  %s1574_s12 = sld [smem:[#allocation14_spill]] }
 0x1db   : > { %s1575_s26 = sld [smem:[#allocation18_spill]]  ;;  %s1576_s28 = sld [smem:[#allocation15_spill]] }
 0x1dc   : > { %s1577_s14 = sld [smem:[#allocation16_spill]]  ;;  %s1578_s30 = sld [smem:[#allocation17_spill]] }
 0x1dd   : > { %s1579_s18 = smov %s1037_s19  ;;  %s1581_s21 = smov %s1049_s22 }
 0x1de   : > { %s1580_s19 = smov %s1571_s17  ;;  %s1582_s22 = smov %s1053_s23 }
 0x1df   : > { %s1584_s24 = smov %s1061_s25  ;;  %s1586_s27 = smov %s1077_s29 }
 0x1e0   : > { %s1583_s23 = smov %s1573_s13  ;;  %s1585_s25 = smov %s1574_s12 }
 0x1e1   :  { %23 = sbr.rel (!%p1477_p1) target bundleno = 14 (0xe), region = 115 }
 0x1e2   : > { %s1587_s29 = smov %s1577_s14 }
 0x1e8   :  { %520 = vsyncpa [#allocation4], 1 }
 0x1e9   :  { %522 = vsyncpa [#allocation4 + $0x1], 1 }
 0x1ea   :  { %523 = vsyncpa [#allocation7], 1 }
 0x1eb   :  { %525 = vsyncpa [#allocation7 + $0x1], 1 }
 0x1ec   :  { %526 = vsyncpa [#allocation5], 1 }
 0x1ed   :  { %528 = vsyncpa [#allocation5 + $0x1], 1 }

</bundles_post_ra>
